<compile_context>
chip_gen: v7x
topology: tpu7x:2x2x1
jax: 0.10.0
libtpu: 0.0.40
codegen_flags: <defaults>
</compile_context>

<pallas_src>
import jax
import jax.numpy as jnp
from jax.experimental import pallas as pl
from jax.experimental.pallas import tpu as pltpu

HIDDEN_DIM = 50
LAYER_DIM = 2        # nn.RNN(num_layers=2) -> two stacked recurrent cells
OUTPUT_DIM = 2

# vreg-aligned padded sizes (all padding is zeros; padded lanes stay exactly 0).
HIDDEN_PAD = 64      # 50 -> 64: sublane-multiple contraction K, clean lane layout
BATCH_PAD = 8        # 2 -> 8: one full sublane tile, no masked partial-sublane ops


def _round_up(x, m):
    return ((x + m - 1) // m) * m


def _make_rnn_kernel(T, B):
    """Build the kernel closure for static (T, padded-B)."""

    def kernel(x_ref,        # (T*B, Dp)   time-major, flattened, zero-padded
               wx0_ref,      # (Dp, Hp)
               wh0_ref,      # (Hp, Hp)
               b0_ref,       # (1, Hp)     b_ih0 + b_hh0
               wx1_ref,      # (Hp, Hp)
               wh1_ref,      # (Hp, Hp)
               b1_ref,       # (1, Hp)     b_ih1 + b_hh1
               wfc_ref,      # (Hp, O)
               bfc_ref,      # (1, O)
               out_ref):     # (B, O)
        H = wh0_ref.shape[-1]

        # Hoist every loop-invariant load / broadcast out of the unrolled loop.
        wh0 = wh0_ref[...]
        wx1 = wx1_ref[...]
        wh1 = wh1_ref[...]
        b1b = jnp.broadcast_to(b1_ref[...], (B, H))

        # Off-critical-path: project the ENTIRE input sequence with one MXU dot
        # and fold in the layer-0 bias.  (T*B, Dp) @ (Dp, Hp) -> (T*B, Hp).
        xw0 = (jnp.dot(x_ref[...], wx0_ref[...],
                       preferred_element_type=jnp.float32)
               + jnp.broadcast_to(b0_ref[...], (T * B, H)))

        # h0 = zeros(layer_dim, B, hidden) in the PyTorch forward — state lives
        # in vregs, not VMEM scratch.
        h1 = jnp.zeros((B, H), jnp.float32)
        h2 = jnp.zeros((B, H), jnp.float32)

        # Fully-unrolled static time loop.
        for t in range(T):
            # Layer-1 recurrent dot first: depends only on h2_{t-1}, so it can
            # pipeline under layer 0 of this step.
            h2w = jnp.dot(h2, wh1, preferred_element_type=jnp.float32)
            # Layer 0: serial chain is one dot + add + tanh (x-term precomputed).
            h1 = jnp.tanh(xw0[t * B:(t + 1) * B]
                          + jnp.dot(h1, wh0, preferred_element_type=jnp.float32))
            # Layer 1: one dependent dot + adds + tanh.
            h2 = jnp.tanh(jnp.dot(h1, wx1, preferred_element_type=jnp.float32)
                          + h2w + b1b)

        # out = fc(out[:, -1, :])  — fc on the top layer's last-step state.
        out_ref[...] = (jnp.dot(h2, wfc_ref[...],
                                preferred_element_type=jnp.float32)
                        + bfc_ref[...])

    return kernel


def prepare_params(params, input_dim):
    """One-time parameter prep: zero-pad to vreg-aligned shapes.

    Zero-padded weight columns / bias lanes guarantee padded hidden lanes are
    exactly 0 after tanh, so the unpadded result is bit-identical math-wise.
    """
    wx0, wh0, b0, wx1, wh1, b1, wfc, bfc = params
    Dp = _round_up(input_dim, 8)
    Hp = HIDDEN_PAD

    def pad(a, shape):
        return jnp.pad(a, [(0, s - d) for d, s in zip(a.shape, shape)])

    return (pad(wx0, (Dp, Hp)), pad(wh0, (Hp, Hp)), pad(b0, (1, Hp)),
            pad(wx1, (Hp, Hp)), pad(wh1, (Hp, Hp)), pad(b1, (1, Hp)),
            pad(wfc, (Hp, OUTPUT_DIM)), bfc)


def simple_rnn_forward(x, padded_params):
    """x: (B, T, D) float32, batch_first like the PyTorch module."""
    B, T, D = x.shape
    Bp = _round_up(B, BATCH_PAD)
    Dp = padded_params[0].shape[0]

    # Time-major + zero-pad batch/feature dims, flattened to a lane-dense
    # (T*Bp, Dp) slab so the in-kernel input projection is one aligned MXU dot.
    x_tm = jnp.transpose(x, (1, 0, 2))                           # (T, B, D)
    x_tm = jnp.pad(x_tm, ((0, 0), (0, Bp - B), (0, Dp - D)))     # (T, Bp, Dp)
    x_flat = x_tm.reshape(T * Bp, Dp)

    vmem = pl.BlockSpec(memory_space=pltpu.MemorySpace.VMEM)     # whole array in VMEM

    out = pl.pallas_call(
        _make_rnn_kernel(T, Bp),
        out_shape=jax.ShapeDtypeStruct((Bp, OUTPUT_DIM), jnp.float32),
        in_specs=[vmem] * 9,
        out_specs=vmem,
    )(x_flat, *padded_params)
    return out[:B]


def init_params(key, input_dim, hidden_dim=HIDDEN_DIM, output_dim=OUTPUT_DIM):
    """Deterministic init mirroring PyTorch shapes (weights stored transposed)."""
    ks = jax.random.split(key, 10)
    bound = 1.0 / jnp.sqrt(hidden_dim)

    def u(k, shape):
        return jax.random.uniform(k, shape, jnp.float32, -bound, bound)

    # layer 0: W_ih (H, D), W_hh (H, H), b_ih (H,), b_hh (H,) -> transposed / fused bias
    wx0 = u(ks[0], (input_dim, hidden_dim))
    wh0 = u(ks[1], (hidden_dim, hidden_dim))
    b0 = (u(ks[2], (hidden_dim,)) + u(ks[3], (hidden_dim,))).reshape(1, hidden_dim)
    # layer 1: W_ih (H, H), W_hh (H, H)
    wx1 = u(ks[4], (hidden_dim, hidden_dim))
    wh1 = u(ks[5], (hidden_dim, hidden_dim))
    b1 = (u(ks[6], (hidden_dim,)) + u(ks[7], (hidden_dim,))).reshape(1, hidden_dim)
    # fc: Linear(H, O)
    wfc = u(ks[8], (hidden_dim, output_dim))
    bfc = u(ks[9], (output_dim,)).reshape(1, output_dim)
    return (wx0, wh0, b0, wx1, wh1, b1, wfc, bfc)


def reference_forward(x, params):
    """Pure-JAX reference of the PyTorch forward for validation."""
    wx0, wh0, b0, wx1, wh1, b1, wfc, bfc = params
    B, T, D = x.shape
    h1 = jnp.zeros((B, HIDDEN_DIM), jnp.float32)
    h2 = jnp.zeros((B, HIDDEN_DIM), jnp.float32)
    for t in range(T):
        xt = x[:, t, :]
        h1 = jnp.tanh(xt @ wx0 + h1 @ wh0 + b0)
        h2 = jnp.tanh(h1 @ wx1 + h2 @ wh1 + b1)
    return h2 @ wfc + bfc


if __name__ == "__main__":
    key = jax.random.PRNGKey(0)
    k_x, k_p = jax.random.split(key)

    B, T, D = 2, 8, 16          # batch, sequence length, input_dim
    x = jax.random.normal(k_x, (B, T, D), jnp.float32)
    params = init_params(k_p, input_dim=D)
    padded_params = prepare_params(params, input_dim=D)

    out = simple_rnn_forward(x, padded_params)
    out = jax.block_until_ready(out)

    ref = reference_forward(x, params)
    assert out.shape == (B, OUTPUT_DIM)
    assert jnp.allclose(out, ref, atol=1e-5, rtol=1e-5), (out, ref)

    print("KERNEL_OK")
</pallas_src>

<mosaic_0001>
module attributes {stable_mosaic.version = 11 : i64} {
  func.func @kernel(%arg0: memref<64x16xf32, #tpu.memory_space<vmem>>, %arg1: memref<16x64xf32, #tpu.memory_space<vmem>>, %arg2: memref<64x64xf32, #tpu.memory_space<vmem>>, %arg3: memref<1x64xf32, #tpu.memory_space<vmem>>, %arg4: memref<64x64xf32, #tpu.memory_space<vmem>>, %arg5: memref<64x64xf32, #tpu.memory_space<vmem>>, %arg6: memref<1x64xf32, #tpu.memory_space<vmem>>, %arg7: memref<64x2xf32, #tpu.memory_space<vmem>>, %arg8: memref<1x2xf32, #tpu.memory_space<vmem>>, %arg9: memref<8x2xf32, #tpu.memory_space<vmem>>) attributes {dimension_semantics = [], scalar_prefetch = 0 : i64, scratch_operands = 0 : i64, tpu.core_type = #tpu.core_type<tc>} {
    %c0 = arith.constant 0 : index
    %c0_0 = arith.constant 0 : index
    %0 = vector.load %arg2[%c0, %c0_0] : memref<64x64xf32, #tpu.memory_space<vmem>>, vector<64x64xf32>
    %c0_1 = arith.constant 0 : index
    %c0_2 = arith.constant 0 : index
    %1 = vector.load %arg4[%c0_1, %c0_2] : memref<64x64xf32, #tpu.memory_space<vmem>>, vector<64x64xf32>
    %c0_3 = arith.constant 0 : index
    %c0_4 = arith.constant 0 : index
    %2 = vector.load %arg5[%c0_3, %c0_4] : memref<64x64xf32, #tpu.memory_space<vmem>>, vector<64x64xf32>
    %c0_5 = arith.constant 0 : index
    %c0_6 = arith.constant 0 : index
    %3 = vector.load %arg6[%c0_5, %c0_6] : memref<1x64xf32, #tpu.memory_space<vmem>>, vector<1x64xf32>
    %4 = vector.shape_cast %3 : vector<1x64xf32> to vector<1x64xf32>
    %5 = vector.broadcast %4 : vector<1x64xf32> to vector<8x64xf32>
    %c0_7 = arith.constant 0 : index
    %c0_8 = arith.constant 0 : index
    %6 = vector.load %arg0[%c0_7, %c0_8] : memref<64x16xf32, #tpu.memory_space<vmem>>, vector<64x16xf32>
    %c0_9 = arith.constant 0 : index
    %c0_10 = arith.constant 0 : index
    %7 = vector.load %arg1[%c0_9, %c0_10] : memref<16x64xf32, #tpu.memory_space<vmem>>, vector<16x64xf32>
    %cst = arith.constant dense<0.000000e+00> : vector<64x64xf32>
    %8 = tpu.matmul %6, %7, %cst {dimension_numbers = #tpu.dot_dimension_numbers<[1], [0], [0], [1], [0, 0, 1, 1], [], []>} : vector<64x16xf32>, vector<16x64xf32>, vector<64x64xf32> -> vector<64x64xf32>
    %c0_11 = arith.constant 0 : index
    %c0_12 = arith.constant 0 : index
    %9 = vector.load %arg3[%c0_11, %c0_12] : memref<1x64xf32, #tpu.memory_space<vmem>>, vector<1x64xf32>
    %10 = vector.shape_cast %9 : vector<1x64xf32> to vector<1x64xf32>
    %11 = vector.broadcast %10 : vector<1x64xf32> to vector<64x64xf32>
    %12 = arith.addf %8, %11 : vector<64x64xf32>
    %cst_13 = arith.constant 0.000000e+00 : f32
    %13 = vector.broadcast %cst_13 : f32 to vector<8x64xf32>
    %cst_14 = arith.constant 0.000000e+00 : f32
    %14 = vector.broadcast %cst_14 : f32 to vector<8x64xf32>
    %cst_15 = arith.constant dense<0.000000e+00> : vector<8x64xf32>
    %15 = tpu.matmul %14, %2, %cst_15 {dimension_numbers = #tpu.dot_dimension_numbers<[1], [0], [0], [1], [0, 0, 1, 1], [], []>} : vector<8x64xf32>, vector<64x64xf32>, vector<8x64xf32> -> vector<8x64xf32>
    %16 = vector.extract_strided_slice %12 {offsets = [0, 0], sizes = [8, 64], strides = [1, 1]} : vector<64x64xf32> to vector<8x64xf32>
    %cst_16 = arith.constant dense<0.000000e+00> : vector<8x64xf32>
    %17 = tpu.matmul %13, %0, %cst_16 {dimension_numbers = #tpu.dot_dimension_numbers<[1], [0], [0], [1], [0, 0, 1, 1], [], []>} : vector<8x64xf32>, vector<64x64xf32>, vector<8x64xf32> -> vector<8x64xf32>
    %18 = arith.addf %16, %17 : vector<8x64xf32>
    %19 = math.tanh %18 : vector<8x64xf32>
    %cst_17 = arith.constant dense<0.000000e+00> : vector<8x64xf32>
    %20 = tpu.matmul %19, %1, %cst_17 {dimension_numbers = #tpu.dot_dimension_numbers<[1], [0], [0], [1], [0, 0, 1, 1], [], []>} : vector<8x64xf32>, vector<64x64xf32>, vector<8x64xf32> -> vector<8x64xf32>
    %21 = arith.addf %20, %15 : vector<8x64xf32>
    %22 = arith.addf %21, %5 : vector<8x64xf32>
    %23 = math.tanh %22 : vector<8x64xf32>
    %cst_18 = arith.constant dense<0.000000e+00> : vector<8x64xf32>
    %24 = tpu.matmul %23, %2, %cst_18 {dimension_numbers = #tpu.dot_dimension_numbers<[1], [0], [0], [1], [0, 0, 1, 1], [], []>} : vector<8x64xf32>, vector<64x64xf32>, vector<8x64xf32> -> vector<8x64xf32>
    %25 = vector.extract_strided_slice %12 {offsets = [8, 0], sizes = [8, 64], strides = [1, 1]} : vector<64x64xf32> to vector<8x64xf32>
    %cst_19 = arith.constant dense<0.000000e+00> : vector<8x64xf32>
    %26 = tpu.matmul %19, %0, %cst_19 {dimension_numbers = #tpu.dot_dimension_numbers<[1], [0], [0], [1], [0, 0, 1, 1], [], []>} : vector<8x64xf32>, vector<64x64xf32>, vector<8x64xf32> -> vector<8x64xf32>
    %27 = arith.addf %25, %26 : vector<8x64xf32>
    %28 = math.tanh %27 : vector<8x64xf32>
    %cst_20 = arith.constant dense<0.000000e+00> : vector<8x64xf32>
    %29 = tpu.matmul %28, %1, %cst_20 {dimension_numbers = #tpu.dot_dimension_numbers<[1], [0], [0], [1], [0, 0, 1, 1], [], []>} : vector<8x64xf32>, vector<64x64xf32>, vector<8x64xf32> -> vector<8x64xf32>
    %30 = arith.addf %29, %24 : vector<8x64xf32>
    %31 = arith.addf %30, %5 : vector<8x64xf32>
    %32 = math.tanh %31 : vector<8x64xf32>
    %cst_21 = arith.constant dense<0.000000e+00> : vector<8x64xf32>
    %33 = tpu.matmul %32, %2, %cst_21 {dimension_numbers = #tpu.dot_dimension_numbers<[1], [0], [0], [1], [0, 0, 1, 1], [], []>} : vector<8x64xf32>, vector<64x64xf32>, vector<8x64xf32> -> vector<8x64xf32>
    %34 = vector.extract_strided_slice %12 {offsets = [16, 0], sizes = [8, 64], strides = [1, 1]} : vector<64x64xf32> to vector<8x64xf32>
    %cst_22 = arith.constant dense<0.000000e+00> : vector<8x64xf32>
    %35 = tpu.matmul %28, %0, %cst_22 {dimension_numbers = #tpu.dot_dimension_numbers<[1], [0], [0], [1], [0, 0, 1, 1], [], []>} : vector<8x64xf32>, vector<64x64xf32>, vector<8x64xf32> -> vector<8x64xf32>
    %36 = arith.addf %34, %35 : vector<8x64xf32>
    %37 = math.tanh %36 : vector<8x64xf32>
    %cst_23 = arith.constant dense<0.000000e+00> : vector<8x64xf32>
    %38 = tpu.matmul %37, %1, %cst_23 {dimension_numbers = #tpu.dot_dimension_numbers<[1], [0], [0], [1], [0, 0, 1, 1], [], []>} : vector<8x64xf32>, vector<64x64xf32>, vector<8x64xf32> -> vector<8x64xf32>
    %39 = arith.addf %38, %33 : vector<8x64xf32>
    %40 = arith.addf %39, %5 : vector<8x64xf32>
    %41 = math.tanh %40 : vector<8x64xf32>
    %cst_24 = arith.constant dense<0.000000e+00> : vector<8x64xf32>
    %42 = tpu.matmul %41, %2, %cst_24 {dimension_numbers = #tpu.dot_dimension_numbers<[1], [0], [0], [1], [0, 0, 1, 1], [], []>} : vector<8x64xf32>, vector<64x64xf32>, vector<8x64xf32> -> vector<8x64xf32>
    %43 = vector.extract_strided_slice %12 {offsets = [24, 0], sizes = [8, 64], strides = [1, 1]} : vector<64x64xf32> to vector<8x64xf32>
    %cst_25 = arith.constant dense<0.000000e+00> : vector<8x64xf32>
    %44 = tpu.matmul %37, %0, %cst_25 {dimension_numbers = #tpu.dot_dimension_numbers<[1], [0], [0], [1], [0, 0, 1, 1], [], []>} : vector<8x64xf32>, vector<64x64xf32>, vector<8x64xf32> -> vector<8x64xf32>
    %45 = arith.addf %43, %44 : vector<8x64xf32>
    %46 = math.tanh %45 : vector<8x64xf32>
    %cst_26 = arith.constant dense<0.000000e+00> : vector<8x64xf32>
    %47 = tpu.matmul %46, %1, %cst_26 {dimension_numbers = #tpu.dot_dimension_numbers<[1], [0], [0], [1], [0, 0, 1, 1], [], []>} : vector<8x64xf32>, vector<64x64xf32>, vector<8x64xf32> -> vector<8x64xf32>
    %48 = arith.addf %47, %42 : vector<8x64xf32>
    %49 = arith.addf %48, %5 : vector<8x64xf32>
    %50 = math.tanh %49 : vector<8x64xf32>
    %cst_27 = arith.constant dense<0.000000e+00> : vector<8x64xf32>
    %51 = tpu.matmul %50, %2, %cst_27 {dimension_numbers = #tpu.dot_dimension_numbers<[1], [0], [0], [1], [0, 0, 1, 1], [], []>} : vector<8x64xf32>, vector<64x64xf32>, vector<8x64xf32> -> vector<8x64xf32>
    %52 = vector.extract_strided_slice %12 {offsets = [32, 0], sizes = [8, 64], strides = [1, 1]} : vector<64x64xf32> to vector<8x64xf32>
    %cst_28 = arith.constant dense<0.000000e+00> : vector<8x64xf32>
    %53 = tpu.matmul %46, %0, %cst_28 {dimension_numbers = #tpu.dot_dimension_numbers<[1], [0], [0], [1], [0, 0, 1, 1], [], []>} : vector<8x64xf32>, vector<64x64xf32>, vector<8x64xf32> -> vector<8x64xf32>
    %54 = arith.addf %52, %53 : vector<8x64xf32>
    %55 = math.tanh %54 : vector<8x64xf32>
    %cst_29 = arith.constant dense<0.000000e+00> : vector<8x64xf32>
    %56 = tpu.matmul %55, %1, %cst_29 {dimension_numbers = #tpu.dot_dimension_numbers<[1], [0], [0], [1], [0, 0, 1, 1], [], []>} : vector<8x64xf32>, vector<64x64xf32>, vector<8x64xf32> -> vector<8x64xf32>
    %57 = arith.addf %56, %51 : vector<8x64xf32>
    %58 = arith.addf %57, %5 : vector<8x64xf32>
    %59 = math.tanh %58 : vector<8x64xf32>
    %cst_30 = arith.constant dense<0.000000e+00> : vector<8x64xf32>
    %60 = tpu.matmul %59, %2, %cst_30 {dimension_numbers = #tpu.dot_dimension_numbers<[1], [0], [0], [1], [0, 0, 1, 1], [], []>} : vector<8x64xf32>, vector<64x64xf32>, vector<8x64xf32> -> vector<8x64xf32>
    %61 = vector.extract_strided_slice %12 {offsets = [40, 0], sizes = [8, 64], strides = [1, 1]} : vector<64x64xf32> to vector<8x64xf32>
    %cst_31 = arith.constant dense<0.000000e+00> : vector<8x64xf32>
    %62 = tpu.matmul %55, %0, %cst_31 {dimension_numbers = #tpu.dot_dimension_numbers<[1], [0], [0], [1], [0, 0, 1, 1], [], []>} : vector<8x64xf32>, vector<64x64xf32>, vector<8x64xf32> -> vector<8x64xf32>
    %63 = arith.addf %61, %62 : vector<8x64xf32>
    %64 = math.tanh %63 : vector<8x64xf32>
    %cst_32 = arith.constant dense<0.000000e+00> : vector<8x64xf32>
    %65 = tpu.matmul %64, %1, %cst_32 {dimension_numbers = #tpu.dot_dimension_numbers<[1], [0], [0], [1], [0, 0, 1, 1], [], []>} : vector<8x64xf32>, vector<64x64xf32>, vector<8x64xf32> -> vector<8x64xf32>
    %66 = arith.addf %65, %60 : vector<8x64xf32>
    %67 = arith.addf %66, %5 : vector<8x64xf32>
    %68 = math.tanh %67 : vector<8x64xf32>
    %cst_33 = arith.constant dense<0.000000e+00> : vector<8x64xf32>
    %69 = tpu.matmul %68, %2, %cst_33 {dimension_numbers = #tpu.dot_dimension_numbers<[1], [0], [0], [1], [0, 0, 1, 1], [], []>} : vector<8x64xf32>, vector<64x64xf32>, vector<8x64xf32> -> vector<8x64xf32>
    %70 = vector.extract_strided_slice %12 {offsets = [48, 0], sizes = [8, 64], strides = [1, 1]} : vector<64x64xf32> to vector<8x64xf32>
    %cst_34 = arith.constant dense<0.000000e+00> : vector<8x64xf32>
    %71 = tpu.matmul %64, %0, %cst_34 {dimension_numbers = #tpu.dot_dimension_numbers<[1], [0], [0], [1], [0, 0, 1, 1], [], []>} : vector<8x64xf32>, vector<64x64xf32>, vector<8x64xf32> -> vector<8x64xf32>
    %72 = arith.addf %70, %71 : vector<8x64xf32>
    %73 = math.tanh %72 : vector<8x64xf32>
    %cst_35 = arith.constant dense<0.000000e+00> : vector<8x64xf32>
    %74 = tpu.matmul %73, %1, %cst_35 {dimension_numbers = #tpu.dot_dimension_numbers<[1], [0], [0], [1], [0, 0, 1, 1], [], []>} : vector<8x64xf32>, vector<64x64xf32>, vector<8x64xf32> -> vector<8x64xf32>
    %75 = arith.addf %74, %69 : vector<8x64xf32>
    %76 = arith.addf %75, %5 : vector<8x64xf32>
    %77 = math.tanh %76 : vector<8x64xf32>
    %cst_36 = arith.constant dense<0.000000e+00> : vector<8x64xf32>
    %78 = tpu.matmul %77, %2, %cst_36 {dimension_numbers = #tpu.dot_dimension_numbers<[1], [0], [0], [1], [0, 0, 1, 1], [], []>} : vector<8x64xf32>, vector<64x64xf32>, vector<8x64xf32> -> vector<8x64xf32>
    %79 = vector.extract_strided_slice %12 {offsets = [56, 0], sizes = [8, 64], strides = [1, 1]} : vector<64x64xf32> to vector<8x64xf32>
    %cst_37 = arith.constant dense<0.000000e+00> : vector<8x64xf32>
    %80 = tpu.matmul %73, %0, %cst_37 {dimension_numbers = #tpu.dot_dimension_numbers<[1], [0], [0], [1], [0, 0, 1, 1], [], []>} : vector<8x64xf32>, vector<64x64xf32>, vector<8x64xf32> -> vector<8x64xf32>
    %81 = arith.addf %79, %80 : vector<8x64xf32>
    %82 = math.tanh %81 : vector<8x64xf32>
    %cst_38 = arith.constant dense<0.000000e+00> : vector<8x64xf32>
    %83 = tpu.matmul %82, %1, %cst_38 {dimension_numbers = #tpu.dot_dimension_numbers<[1], [0], [0], [1], [0, 0, 1, 1], [], []>} : vector<8x64xf32>, vector<64x64xf32>, vector<8x64xf32> -> vector<8x64xf32>
    %84 = arith.addf %83, %78 : vector<8x64xf32>
    %85 = arith.addf %84, %5 : vector<8x64xf32>
    %86 = math.tanh %85 : vector<8x64xf32>
    %c0_39 = arith.constant 0 : index
    %c0_40 = arith.constant 0 : index
    %87 = vector.load %arg7[%c0_39, %c0_40] : memref<64x2xf32, #tpu.memory_space<vmem>>, vector<64x2xf32>
    %cst_41 = arith.constant dense<0.000000e+00> : vector<8x2xf32>
    %88 = tpu.matmul %86, %87, %cst_41 {dimension_numbers = #tpu.dot_dimension_numbers<[1], [0], [0], [1], [0, 0, 1, 1], [], []>} : vector<8x64xf32>, vector<64x2xf32>, vector<8x2xf32> -> vector<8x2xf32>
    %c0_42 = arith.constant 0 : index
    %c0_43 = arith.constant 0 : index
    %89 = vector.load %arg8[%c0_42, %c0_43] : memref<1x2xf32, #tpu.memory_space<vmem>>, vector<1x2xf32>
    %90 = vector.broadcast %89 : vector<1x2xf32> to vector<8x2xf32>
    %91 = arith.addf %88, %90 : vector<8x2xf32>
    %c0_44 = arith.constant 0 : index
    %c0_45 = arith.constant 0 : index
    %92 = vector.load %arg9[%c0_44, %c0_45] : memref<8x2xf32, #tpu.memory_space<vmem>>, vector<8x2xf32>
    tpu.vector_store %arg9[%c0_44, %c0_45], %91 {strides = array<i32>} : memref<8x2xf32, #tpu.memory_space<vmem>>, vector<8x2xf32>,
    return
  }
}

</mosaic_0001>

<bundles_post_ra>
// kernel: tpu_custom_call.1
= control target key start
LH: loop header
LB: loop body
LE: loop exit
PB: predicated region body
PF: predicated region fallthrough
CT: control target
= control target key end

     0   :  { %14 = vsyncpa [#allocation3], 0  ;;  %s3206_s30 = smov [#allocation2]   ;;  %s3719_s0 = inlined_call_operand.vmem [shape: f32[64,16], index: 0, kind: input, shape index: {}]   ;;  %s3720_s1 = inlined_call_operand.vmem [shape: f32[16,64], index: 1, kind: input, shape index: {}]   ;;  %s3721_s2 = inlined_call_operand.vmem [shape: f32[64,64], index: 2, kind: input, shape index: {}]   ;;  %s3722_s3 = inlined_call_operand.vmem [shape: f32[1,64], index: 3, kind: input, shape index: {}]   ;;  %s3723_s4 = inlined_call_operand.vmem [shape: f32[64,64], index: 4, kind: input, shape index: {}]   ;;  %s3724_s5 = inlined_call_operand.hbm [shape: f32[64,64], index: 5, kind: input, shape index: {}]   ;;  %s3725_s6 = inlined_call_operand.vmem [shape: f32[1,64], index: 6, kind: input, shape index: {}]   ;;  %s3726_s7 = inlined_call_operand.vmem [shape: f32[64,2], index: 7, kind: input, shape index: {}]   ;;  %s3727_s8 = inlined_call_operand.vmem [shape: f32[1,2], index: 8, kind: input, shape index: {}]   ;;  %s3728_s9 = inlined_call_operand.vmem [shape: f32[8,2], index: 9, kind: output, shape index: {}]  }
   0x1   :  { %s30_s10 = sshll.u32 %s3206_s30, 4  ;;  %s3182_s13 = scalar_lea.hbm %s3724_s5, 1024  ;;  %s31_s10 = int_to_ptr.vmem [resolvable:$true] %s30_s10 }
   0x2   :  { %p3183_p0 = scmp.ne.s32.totalorder %s3724_s5, %s3182_s13  ;;  %p3186_p1 = scmp.lt.u32.totalorder %s3182_s13, %s3724_s5 }
   0x4   :  { %p3188_p2 = pnand %p3186_p1, %p3183_p0 }
   0x6   :  { %3191 = shalt.err (!%p3188_p2)
}
   0x7   :  { %s3192_s18 = scalar_lea.vmem %s31_s10, 1024  ;;  %p3197_p4 = scmp.lt.s32.totalorder %s31_s10, %s31_s10 }
   0x8   :  { %p3193_p3 = scmp.ne.s32.totalorder %s31_s10, %s3192_s18  ;;  %p3198_p5 = scmp.lt.s32.totalorder %s3192_s18, %s3192_s18 }
   0xa   :  { %p3199_p6 = por %p3198_p5, %p3197_p4 }
   0xc   :  { %p3200_p7 = pnand %p3199_p6, %p3193_p3 }
   0xe   :  { %3203 = shalt.err (!%p3200_p7)
}
   0xf   :  { %s3207_s19 = smov 128   ;;  %s3208_s20 = smov 8  }
  0x10   :  { %36 = dma.hbm_to_vmem [thread:$0]  %s3724_s5, 1024, %s31_s10, [#allocation3], %s3207_s19, %s3207_s19, %s3208_s20  }
  0x11   :  { %3204 = dma.done.wait [#allocation3], 1024  }
  0x12   :  { %3205 = vsyncadd [#allocation3], 4294966272  ;;  %v3209_v0 = vmov 0.0|0.0   ;;  %vm3210_vm0 = vmmov 0   ;;  %v3211_v1 = vmov 0.0   ;;  %vm94_vm1 = vcmask 130048  }
  0x13   :  { %2844 = vmatprep.subr.bf16.mxu1 %v3209_v0  ;;  %2381 = vmatprep.mubr.msk.f32.mxu1 %vm3210_vm0, %v3211_v1  ;;  %v85_v2 = vld [vmem:[%s3720_s1] sm:$0xff]  ;;  %v86_v3 = vld [vmem:[%s3720_s1 + $0x8] sm:$0xff]  ;;  %v79_v10 = vld [vmem:[%s3719_s0 + $0x10] sm:$0xff]  ;;  %vm224_vm2 = vcmask 523264   ;;  %vm2073_vm3 = vcmask 15360  }
  0x14   :  { %v77_v4 = vld [vmem:[%s3719_s0] sm:$0xff]  ;;  %v2840_v5 = vpack.c.bf16 %v86_v3, %v85_v2  ;;  %v47_v7 = vld [vmem:[%s3721_s2 + $0x8] sm:$0xff]  ;;  %v48_v11 = vld [vmem:[%s3721_s2 + $0x10] sm:$0xff] }
  0x15   :  { %2353 = vmatprep.mubr.msk.f32.mxu0 %vm94_vm1, %v77_v4  ;;  %v46_v6 = vld [vmem:[%s3721_s2] sm:$0xff]  ;;  %v78_v8 = vld [vmem:[%s3719_s0 + $0x8] sm:$0xff]  ;;  %v49_v12 = vld [vmem:[%s3721_s2 + $0x18] sm:$0xff] }
  0x16   :  { %2841 = vmatprep.subr.bf16.mxu0 %v2840_v5  ;;  %v3296_v9 = vpack.c.bf16 %v47_v7, %v46_v6  ;;  %v62_v13 = vld [vmem:[#allocation2] sm:$0xff]  ;;  %v63_v14 = vld [vmem:[#allocation2 + $0x8] sm:$0xff]  ;;  %v80_v16 = vld [vmem:[%s3719_s0 + $0x18] sm:$0xff]  ;;  %v3316_v17 = vpack.c.bf16 %v49_v12, %v48_v11 }
  0x17   :  { %2843 = vmatpush3.bf16.msra.mxu0 %v2840_v5  ;;  %v3309_v15 = vpack.c.bf16 %v63_v14, %v62_v13  ;;  %v81_v18 = vld [vmem:[%s3719_s0 + $0x20] sm:$0xff]  ;;  %v51_v20 = vld [vmem:[%s3721_s2 + $0x28] sm:$0xff]  ;;  %v83_v23 = vld [vmem:[%s3719_s0 + $0x30] sm:$0xff] }
  0x18   :  { %2856 = vmatprep.subr.bf16.mxu0 %v3209_v0  ;;  %v50_v19 = vld [vmem:[%s3721_s2 + $0x20] sm:$0xff]  ;;  %v82_v21 = vld [vmem:[%s3719_s0 + $0x28] sm:$0xff]  ;;  %v52_v24 = vld [vmem:[%s3721_s2 + $0x30] sm:$0xff] }
  0x19   :  { %2846 = vmatpush3.bf16.msra.mxu1 %v3309_v15  ;;  %v3336_v22 = vpack.c.bf16 %v51_v20, %v50_v19  ;;  %v53_v25 = vld [vmem:[%s3721_s2 + $0x38] sm:$0xff]  ;;  %v64_v28 = vld [vmem:[#allocation2 + $0x10] sm:$0xff]  ;;  %v66_v31 = vld [vmem:[#allocation2 + $0x20] sm:$0xff] }
  0x1a   :  { %2354 = vmatmul.mubr.msk.f32.vlgmr.msra.gmra.mrb[0].mxu0 %vm94_vm1, %v78_v8  ;;  %2847 = vmatprep.subr.bf16.mxu1 %v3209_v0  ;;  %v84_v26 = vld [vmem:[%s3719_s0 + $0x38] sm:$0xff]  ;;  %v3354_v27 = vpack.c.bf16 %v53_v25, %v52_v24  ;;  %v67_v32 = vld [vmem:[#allocation2 + $0x28] sm:$0xff]  ;;  %v68_v34 = vld [vmem:[#allocation2 + $0x30] sm:$0xff] }
  0x1b   :  { %2858 = vmatpush3.bf16.msra.mxu0 %v3296_v9  ;;  %2356 = vmatprep.mubr.msk.f32.mxu0 %vm94_vm1, %v79_v10  ;;  %v65_v29 = vld [vmem:[#allocation2 + $0x18] sm:$0xff]  ;;  %v3373_v33 = vpack.c.bf16 %v67_v32, %v66_v31  ;;  %v54_v37 = vld [vmem:[%s3723_s4] sm:$0xff]  ;;  %v55_v38 = vld [vmem:[%s3723_s4 + $0x8] sm:$0xff] }
  0x1c   :  { %2859 = vmatprep.subr.bf16.mxu0 %v3209_v0  ;;  %v3367_v30 = vpack.c.bf16 %v65_v29, %v64_v28  ;;  %v69_v35 = vld [vmem:[#allocation2 + $0x38] sm:$0xff]  ;;  %v3391_v39 = vpack.c.bf16 %v55_v38, %v54_v37  ;;  %v56_v40 = vld [vmem:[%s3723_s4 + $0x10] sm:$0xff]  ;;  %v58_v43 = vld [vmem:[%s3723_s4 + $0x20] sm:$0xff] }
  0x1d   :  { %v3379_v36 = vpack.c.bf16 %v69_v35, %v68_v34  ;;  %v57_v41 = vld [vmem:[%s3723_s4 + $0x18] sm:$0xff]  ;;  %v59_v44 = vld [vmem:[%s3723_s4 + $0x28] sm:$0xff]  ;;  %v60_v45 = vld [vmem:[%s3723_s4 + $0x30] sm:$0xff] }
  0x1e   :  { %2357 = vmatmul.mubr.msk.f32.gmra.mrb[2].mxu0 %vm94_vm1, %v80_v16  ;;  %2849 = vmatpush3.bf16.msra.mxu1 %v3367_v30  ;;  %v3404_v42 = vpack.c.bf16 %v57_v41, %v56_v40  ;;  %v3417_v46 = vpack.c.bf16 %v59_v44, %v58_v43  ;;  %v61_v47 = vld [vmem:[%s3723_s4 + $0x38] sm:$0xff]  ;;  %v2081_v49 = vld [vmem:[%s3722_s3] ss:$0 sm:$0xff] }
  0x1f   :  { %2861 = vmatpush3.bf16.msra.mxu0 %v3316_v17  ;;  %2359 = vmatprep.mubr.msk.f32.mxu0 %vm94_vm1, %v81_v18  ;;  %v3423_v48 = vpack.c.bf16 %v61_v47, %v60_v45  ;;  %v3468_v11 = vld [vmem:[%s3725_s6] ss:$0 sm:$0xff] }
  0x20   :  { %2862 = vmatprep.subr.bf16.mxu0 %v3209_v0  ;;  %2850 = vmatprep.subr.bf16.mxu1 %v3209_v0 }
  0x22   :  { %2360 = vmatmul.mubr.msk.f32.gmra.mrb[4].mxu0 %vm94_vm1, %v82_v21  ;;  %2852 = vmatpush3.bf16.msra.mxu1 %v3373_v33 }
  0x23   :  { %2864 = vmatpush3.bf16.msra.mxu0 %v3336_v22  ;;  %2362 = vmatprep.mubr.msk.f32.mxu0 %vm94_vm1, %v83_v23 }
  0x24   :  { %2865 = vmatprep.subr.bf16.mxu0 %v3209_v0  ;;  %2853 = vmatprep.subr.bf16.mxu1 %v3209_v0 }
  0x26   :  { %2363 = vmatmul.mubr.msk.f32.gmra.mrb[6].mxu0 %vm94_vm1, %v84_v26  ;;  %2855 = vmatpush3.bf16.msra.mxu1 %v3379_v36 }
  0x27   :  { %2867 = vmatpush3.bf16.msra.mxu0 %v3354_v27  ;;  %2400 = vmatprep.mubr.msk.f32.mxu0 %vm3210_vm0, %v3211_v1 }
  0x28   :  { %2880 = vmatprep.subr.bf16.mxu0 %v3209_v0  ;;  %2868 = vmatprep.subr.bf16.mxu1 %v3209_v0 }
  0x29   :  { %2382 = vmatmul.mubr.f32.vlgmr.msra.gmra.mrb[0].mxu1 %v3211_v1 }
  0x2a   :  { %2401 = vmatmul.mubr.f32.vlgmr.msra.gmra.mrb[8].mxu0 %v3211_v1  ;;  %2870 = vmatpush3.bf16.msra.mxu1 %v3391_v39 }
  0x2b   :  { %2882 = vmatpush3.bf16.msra.mxu0 %v3309_v15  ;;  %2438 = vmatprep.mubr.msk.f32.mxu0 %vm3210_vm0, %v3211_v1 }
  0x2c   :  { %2883 = vmatprep.subr.bf16.mxu0 %v3209_v0  ;;  %2419 = vmatprep.mubr.msk.f32.mxu1 %vm3210_vm0, %v3211_v1 }
  0x2d   :  { %2871 = vmatprep.subr.bf16.mxu1 %v3209_v0 }
  0x2e   :  { %2873 = vmatpush3.bf16.msra.mxu1 %v3404_v42 }
  0x2f   :  { %2885 = vmatpush3.bf16.msra.mxu0 %v3367_v30  ;;  %2874 = vmatprep.subr.bf16.mxu1 %v3209_v0 }
  0x30   :  { %2886 = vmatprep.subr.bf16.mxu0 %v3209_v0 }
  0x32   :  { %2876 = vmatpush3.bf16.msra.mxu1 %v3417_v46 }
  0x33   :  { %2888 = vmatpush3.bf16.msra.mxu0 %v3373_v33  ;;  %2877 = vmatprep.subr.bf16.mxu1 %v3209_v0 }
  0x34   :  { %2889 = vmatprep.subr.bf16.mxu0 %v3209_v0 }
  0x36   :  { %2879 = vmatpush3.bf16.msra.mxu1 %v3423_v48 }
  0x37   :  { %2891 = vmatpush3.bf16.msra.mxu0 %v3379_v36  ;;  %2892 = vmatprep.subr.bf16.mxu1 %v3209_v0 }
  0x38   :  { %2904 = vmatprep.subr.bf16.mxu0 %v3209_v0 }
  0xed   :  { %v2355_v50 = vpop.f32.mrb[0].mxu0 }
  0xee   :  { %v191_v51 = vadd.f32 %v2355_v50, %v2081_v49  ;;  %v185_v52 = vpop.f32.mrb[1].mxu0 }
  0xef   :  { %v186_v3 = vadd.f32 %v2081_v49, %v185_v52 }
  0xf1   :  { %v2358_v53 = vpop.f32.mrb[2].mxu0 }
  0xf2   :  { %v3431_v54 = vadd.f32 %v2358_v53, %v2081_v49  ;;  %v195_v55 = vpop.f32.mrb[3].mxu0 }
  0xf3   :  { %v3433_v56 = vadd.f32 %v2081_v49, %v195_v55 }
  0xf5   :  { %v2361_v57 = vpop.f32.mrb[4].mxu0 }
  0xf6   :  { %v3435_v58 = vadd.f32 %v2361_v57, %v2081_v49  ;;  %v205_v59 = vpop.f32.mrb[5].mxu0 }
  0xf7   :  { %v3437_v60 = vadd.f32 %v2081_v49, %v205_v59 }
  0xf9   :  { %v2364_v61 = vpop.f32.mrb[6].mxu0 }
  0xfa   :  { %v3439_v62 = vadd.f32 %v2364_v61, %v2081_v49  ;;  %v215_v63 = vpop.f32.mrb[7].mxu0 }
  0xfb   :  { %v3441_v2 = vadd.f32 %v2081_v49, %v215_v63 }
  0xfc   :  { %v294_v8 = vpop.f32.mrb[0].mxu1 }
  0xfd   :  { %v364_v4 = vpop.f32.mrb[8].mxu0  ;;  %v2383_v10 = vpop.f32.mrb[1].mxu1 }
  0xfe   :  { %v368_v5 = vadd.f32 %v364_v4, %v186_v3  ;;  %v2402_v6 = vpop.f32.mrb[9].mxu0 }
 0x100   :  { %3150 = vtanh.f32 %v368_v5 }
 0x10a   :  { %v3151_v7 = vpop.eup %3150 }
 0x10b   :  { %2420 = vmatmul.mubr.msk.f32.vlgmr.msra.gmra.mrb[2].mxu1 %vm224_vm2, %v3151_v7 }
 0x10c   :  { %2894 = vmatpush3.bf16.msra.mxu1 %v3296_v9  ;;  %2457 = vmatprep.mubr.msk.f32.mxu1 %vm3210_vm0, %v3211_v1 }
 0x10d   :  { %2895 = vmatprep.subr.bf16.mxu1 %v3209_v0 }
 0x110   :  { %2897 = vmatpush3.bf16.msra.mxu1 %v3316_v17 }
 0x111   :  { %2898 = vmatprep.subr.bf16.mxu1 %v3209_v0 }
 0x114   :  { %2900 = vmatpush3.bf16.msra.mxu1 %v3336_v22 }
 0x115   :  { %2901 = vmatprep.subr.bf16.mxu1 %v3209_v0 }
 0x118   :  { %2903 = vmatpush3.bf16.msra.mxu1 %v3354_v27 }
 0x119   :  { %2916 = vmatprep.subr.bf16.mxu1 %v3209_v0 }
 0x11b   :  { %2458 = vmatmul.mubr.msk.f32.vlgmr.msra.gmra.mrb[4].mxu1 %vm224_vm2, %v3151_v7 }
 0x11c   :  { %2918 = vmatpush3.bf16.msra.mxu1 %v3309_v15  ;;  %2495 = vmatprep.mubr.msk.f32.mxu1 %vm3210_vm0, %v3211_v1 }
 0x11d   :  { %2919 = vmatprep.subr.bf16.mxu1 %v3209_v0 }
 0x120   :  { %2921 = vmatpush3.bf16.msra.mxu1 %v3367_v30 }
 0x121   :  { %2922 = vmatprep.subr.bf16.mxu1 %v3209_v0 }
 0x124   :  { %2924 = vmatpush3.bf16.msra.mxu1 %v3373_v33 }
 0x125   :  { %2925 = vmatprep.subr.bf16.mxu1 %v3209_v0 }
 0x128   :  { %2927 = vmatpush3.bf16.msra.mxu1 %v3379_v36 }
 0x129   :  { %2940 = vmatprep.subr.bf16.mxu1 %v3209_v0 }
 0x1de   :  { %v439_v12 = vpop.f32.mrb[2].mxu1 }
 0x1df   :  { %v440_v13 = vadd.f32 %v439_v12, %v294_v8  ;;  %v2421_v14 = vpop.f32.mrb[3].mxu1 }
 0x1e1   :  { %v443_v16 = vadd.f32 %v3468_v11, %v440_v13 }
 0x1e3   :  { %3152 = vtanh.f32 %v443_v16 }
 0x1ed   :  { %v3153_v18 = vpop.eup %3152 }
 0x1ee   :  { %v584_v19 = vpop.f32.mrb[4].mxu1  ;;  %2439 = vmatmul.mubr.msk.f32.vlgmr.msra.gmra.mrb[10].mxu0 %vm224_vm2, %v3153_v18 }
 0x1ef   :  { %v588_v20 = vadd.f32 %v584_v19, %v191_v51  ;;  %v2459_v21 = vpop.f32.mrb[5].mxu1  ;;  %2906 = vmatpush3.bf16.msra.mxu0 %v3391_v39  ;;  %2476 = vmatprep.mubr.msk.f32.mxu0 %vm3210_vm0, %v3211_v1 }
 0x1f0   :  { %2907 = vmatprep.subr.bf16.mxu0 %v3209_v0 }
 0x1f1   :  { %3154 = vtanh.f32 %v588_v20 }
 0x1f3   :  { %2909 = vmatpush3.bf16.msra.mxu0 %v3404_v42 }
 0x1f4   :  { %2910 = vmatprep.subr.bf16.mxu0 %v3209_v0 }
 0x1f7   :  { %2912 = vmatpush3.bf16.msra.mxu0 %v3417_v46 }
 0x1f8   :  { %2913 = vmatprep.subr.bf16.mxu0 %v3209_v0 }
 0x1fb   :  { %2915 = vmatpush3.bf16.msra.mxu0 %v3423_v48  ;;  %v3155_v23 = vpop.eup %3154 }
 0x1fc   :  { %2928 = vmatprep.subr.bf16.mxu0 %v3209_v0 }
 0x1fe   :  { %2477 = vmatmul.mubr.msk.f32.vlgmr.msra.gmra.mrb[12].mxu0 %vm224_vm2, %v3155_v23 }
 0x1ff   :  { %2930 = vmatpush3.bf16.msra.mxu0 %v3296_v9  ;;  %2514 = vmatprep.mubr.msk.f32.mxu0 %vm3210_vm0, %v3211_v1 }
 0x200   :  { %2931 = vmatprep.subr.bf16.mxu0 %v3209_v0 }
 0x203   :  { %2933 = vmatpush3.bf16.msra.mxu0 %v3316_v17 }
 0x204   :  { %2934 = vmatprep.subr.bf16.mxu0 %v3209_v0 }
 0x207   :  { %2936 = vmatpush3.bf16.msra.mxu0 %v3336_v22 }
 0x208   :  { %2937 = vmatprep.subr.bf16.mxu0 %v3209_v0 }
 0x20b   :  { %2939 = vmatpush3.bf16.msra.mxu0 %v3354_v27 }
 0x20c   :  { %2952 = vmatprep.subr.bf16.mxu0 %v3209_v0 }
 0x20e   :  { %2515 = vmatmul.mubr.msk.f32.vlgmr.msra.gmra.mrb[14].mxu0 %vm224_vm2, %v3155_v23 }
 0x20f   :  { %2954 = vmatpush3.bf16.msra.mxu0 %v3309_v15  ;;  %2552 = vmatprep.mubr.msk.f32.mxu0 %vm3210_vm0, %v3211_v1 }
 0x210   :  { %2955 = vmatprep.subr.bf16.mxu0 %v3209_v0 }
 0x213   :  { %2957 = vmatpush3.bf16.msra.mxu0 %v3367_v30 }
 0x214   :  { %2958 = vmatprep.subr.bf16.mxu0 %v3209_v0 }
 0x217   :  { %2960 = vmatpush3.bf16.msra.mxu0 %v3373_v33 }
 0x218   :  { %2961 = vmatprep.subr.bf16.mxu0 %v3209_v0 }
 0x21b   :  { %2963 = vmatpush3.bf16.msra.mxu0 %v3379_v36 }
 0x21c   :  { %2976 = vmatprep.subr.bf16.mxu0 %v3209_v0 }
 0x2c1   :  { %v514_v24 = vpop.f32.mrb[10].mxu0 }
 0x2c2   :  { %v2440_v25 = vpop.f32.mrb[11].mxu0 }
 0x2d1   :  { %v659_v26 = vpop.f32.mrb[12].mxu0 }
 0x2d2   :  { %v660_v28 = vadd.f32 %v659_v26, %v514_v24  ;;  %v2478_v29 = vpop.f32.mrb[13].mxu0 }
 0x2d4   :  { %v663_v31 = vadd.f32 %v3468_v11, %v660_v28 }
 0x2d6   :  { %3156 = vtanh.f32 %v663_v31 }
 0x2e0   :  { %v3157_v32 = vpop.eup %3156 }
 0x2e1   :  { %2496 = vmatmul.mubr.msk.f32.vlgmr.msra.gmra.mrb[6].mxu1 %vm224_vm2, %v3157_v32  ;;  %v804_v34 = vpop.f32.mrb[14].mxu0 }
 0x2e2   :  { %v808_v35 = vadd.f32 %v804_v34, %v3433_v56  ;;  %2942 = vmatpush3.bf16.msra.mxu1 %v3391_v39  ;;  %v2516_v37 = vpop.f32.mrb[15].mxu0  ;;  %2533 = vmatprep.mubr.msk.f32.mxu1 %vm3210_vm0, %v3211_v1 }
 0x2e3   :  { %2943 = vmatprep.subr.bf16.mxu1 %v3209_v0 }
 0x2e4   :  { %3158 = vtanh.f32 %v808_v35 }
 0x2e6   :  { %2945 = vmatpush3.bf16.msra.mxu1 %v3404_v42 }
 0x2e7   :  { %2946 = vmatprep.subr.bf16.mxu1 %v3209_v0 }
 0x2ea   :  { %2948 = vmatpush3.bf16.msra.mxu1 %v3417_v46 }
 0x2eb   :  { %2949 = vmatprep.subr.bf16.mxu1 %v3209_v0 }
 0x2ee   :  { %v3159_v38 = vpop.eup %3158  ;;  %2951 = vmatpush3.bf16.msra.mxu1 %v3423_v48 }
 0x2ef   :  { %2964 = vmatprep.subr.bf16.mxu1 %v3209_v0 }
 0x2f1   :  { %2534 = vmatmul.mubr.msk.f32.vlgmr.msra.gmra.mrb[8].mxu1 %vm224_vm2, %v3159_v38 }
 0x2f2   :  { %2966 = vmatpush3.bf16.msra.mxu1 %v3296_v9  ;;  %2571 = vmatprep.mubr.msk.f32.mxu1 %vm3210_vm0, %v3211_v1 }
 0x2f3   :  { %2967 = vmatprep.subr.bf16.mxu1 %v3209_v0 }
 0x2f6   :  { %2969 = vmatpush3.bf16.msra.mxu1 %v3316_v17 }
 0x2f7   :  { %2970 = vmatprep.subr.bf16.mxu1 %v3209_v0 }
 0x2fa   :  { %2972 = vmatpush3.bf16.msra.mxu1 %v3336_v22 }
 0x2fb   :  { %2973 = vmatprep.subr.bf16.mxu1 %v3209_v0 }
 0x2fe   :  { %2975 = vmatpush3.bf16.msra.mxu1 %v3354_v27 }
 0x2ff   :  { %2988 = vmatprep.subr.bf16.mxu1 %v3209_v0 }
 0x301   :  { %2572 = vmatmul.mubr.msk.f32.vlgmr.msra.gmra.mrb[10].mxu1 %vm224_vm2, %v3159_v38  ;;  %v1989_v38 = vld [vmem:[%s3726_s7 + $0x20] sm:$0xff] }
 0x302   :  { %2990 = vmatpush3.bf16.msra.mxu1 %v3309_v15  ;;  %2609 = vmatprep.mubr.msk.f32.mxu1 %vm3210_vm0, %v3211_v1 }
 0x303   :  { %2991 = vmatprep.subr.bf16.mxu1 %v3209_v0 }
 0x306   :  { %2993 = vmatpush3.bf16.msra.mxu1 %v3367_v30 }
 0x307   :  { %2994 = vmatprep.subr.bf16.mxu1 %v3209_v0 }
 0x30a   :  { %2996 = vmatpush3.bf16.msra.mxu1 %v3373_v33 }
 0x30b   :  { %2997 = vmatprep.subr.bf16.mxu1 %v3209_v0 }
 0x30e   :  { %2999 = vmatpush3.bf16.msra.mxu1 %v3379_v36 }
 0x30f   :  { %3012 = vmatprep.subr.bf16.mxu1 %v3209_v0 }
 0x3b4   :  { %v734_v40 = vpop.f32.mrb[6].mxu1 }
 0x3b5   :  { %v2497_v41 = vpop.f32.mrb[7].mxu1 }
 0x3c4   :  { %v879_v43 = vpop.f32.mrb[8].mxu1 }
 0x3c5   :  { %v880_v44 = vadd.f32 %v879_v43, %v734_v40  ;;  %v2535_v45 = vpop.f32.mrb[9].mxu1  ;;  %v1990_v40 = vld [vmem:[%s3726_s7 + $0x28] sm:$0xff]  ;;  %v1991_v43 = vld [vmem:[%s3726_s7 + $0x30] sm:$0xff] }
 0x3c6   :  { %v3139_v41 = vpack.c.bf16 %v1990_v40, %v1989_v38 }
 0x3c7   :  { %v883_v47 = vadd.f32 %v3468_v11, %v880_v44  ;;  %v1992_v44 = vld [vmem:[%s3726_s7 + $0x38] sm:$0xff] }
 0x3c8   :  { %v3142_v45 = vpack.c.bf16 %v1992_v44, %v1991_v43 }
 0x3c9   :  { %3160 = vtanh.f32 %v883_v47 }
 0x3d3   :  { %v3161_v49 = vpop.eup %3160 }
 0x3d4   :  { %2553 = vmatmul.mubr.msk.f32.vlgmr.msra.gmra.mrb[16].mxu0 %vm224_vm2, %v3161_v49  ;;  %v1024_v50 = vpop.f32.mrb[10].mxu1 }
 0x3d5   :  { %v1028_v51 = vadd.f32 %v1024_v50, %v3431_v54  ;;  %2978 = vmatpush3.bf16.msra.mxu0 %v3391_v39  ;;  %v2573_v52 = vpop.f32.mrb[11].mxu1  ;;  %2590 = vmatprep.mubr.msk.f32.mxu0 %vm3210_vm0, %v3211_v1 }
 0x3d6   :  { %2979 = vmatprep.subr.bf16.mxu0 %v3209_v0 }
 0x3d7   :  { %3162 = vtanh.f32 %v1028_v51 }
 0x3d9   :  { %2981 = vmatpush3.bf16.msra.mxu0 %v3404_v42 }
 0x3da   :  { %2982 = vmatprep.subr.bf16.mxu0 %v3209_v0 }
 0x3dd   :  { %2984 = vmatpush3.bf16.msra.mxu0 %v3417_v46 }
 0x3de   :  { %2985 = vmatprep.subr.bf16.mxu0 %v3209_v0 }
 0x3e1   :  { %v3163_v53 = vpop.eup %3162  ;;  %2987 = vmatpush3.bf16.msra.mxu0 %v3423_v48 }
 0x3e2   :  { %3000 = vmatprep.subr.bf16.mxu0 %v3209_v0 }
 0x3e4   :  { %2591 = vmatmul.mubr.msk.f32.vlgmr.msra.gmra.mrb[18].mxu0 %vm224_vm2, %v3163_v53 }
 0x3e5   :  { %3002 = vmatpush3.bf16.msra.mxu0 %v3296_v9  ;;  %2628 = vmatprep.mubr.msk.f32.mxu0 %vm3210_vm0, %v3211_v1 }
 0x3e6   :  { %3003 = vmatprep.subr.bf16.mxu0 %v3209_v0 }
 0x3e9   :  { %3005 = vmatpush3.bf16.msra.mxu0 %v3316_v17 }
 0x3ea   :  { %3006 = vmatprep.subr.bf16.mxu0 %v3209_v0 }
 0x3ed   :  { %3008 = vmatpush3.bf16.msra.mxu0 %v3336_v22 }
 0x3ee   :  { %3009 = vmatprep.subr.bf16.mxu0 %v3209_v0 }
 0x3f1   :  { %3011 = vmatpush3.bf16.msra.mxu0 %v3354_v27 }
 0x3f2   :  { %3024 = vmatprep.subr.bf16.mxu0 %v3209_v0 }
 0x3f4   :  { %2629 = vmatmul.mubr.msk.f32.vlgmr.msra.gmra.mrb[20].mxu0 %vm224_vm2, %v3163_v53 }
 0x3f5   :  { %3026 = vmatpush3.bf16.msra.mxu0 %v3309_v15  ;;  %2666 = vmatprep.mubr.msk.f32.mxu0 %vm3210_vm0, %v3211_v1 }
 0x3f6   :  { %3027 = vmatprep.subr.bf16.mxu0 %v3209_v0 }
 0x3f9   :  { %3029 = vmatpush3.bf16.msra.mxu0 %v3367_v30 }
 0x3fa   :  { %3030 = vmatprep.subr.bf16.mxu0 %v3209_v0 }
 0x3fd   :  { %3032 = vmatpush3.bf16.msra.mxu0 %v3373_v33 }
 0x3fe   :  { %3033 = vmatprep.subr.bf16.mxu0 %v3209_v0 }
 0x401   :  { %3035 = vmatpush3.bf16.msra.mxu0 %v3379_v36 }
 0x402   :  { %3048 = vmatprep.subr.bf16.mxu0 %v3209_v0 }
 0x4a7   :  { %v954_v54 = vpop.f32.mrb[16].mxu0 }
 0x4a8   :  { %v2554_v55 = vpop.f32.mrb[17].mxu0 }
 0x4a9   :  { %v2112_v55 = vld [vmem:[%s3727_s8] ss:$0 sm:$0xff] }
 0x4b7   :  { %v1099_v56 = vpop.f32.mrb[18].mxu0 }
 0x4b8   :  { %v1100_v57 = vadd.f32 %v1099_v56, %v954_v54  ;;  %v2592_v59 = vpop.f32.mrb[19].mxu0 }
 0x4ba   :  { %v1103_v61 = vadd.f32 %v3468_v11, %v1100_v57 }
 0x4bc   :  { %3164 = vtanh.f32 %v1103_v61 }
 0x4c6   :  { %v3165_v63 = vpop.eup %3164 }
 0x4c7   :  { %2610 = vmatmul.mubr.msk.f32.vlgmr.msra.gmra.mrb[12].mxu1 %vm224_vm2, %v3165_v63  ;;  %v1244_v3 = vpop.f32.mrb[20].mxu0 }
 0x4c8   :  { %v1248_v4 = vadd.f32 %v1244_v3, %v3437_v60  ;;  %3014 = vmatpush3.bf16.msra.mxu1 %v3391_v39  ;;  %v2630_v5 = vpop.f32.mrb[21].mxu0  ;;  %2647 = vmatprep.mubr.msk.f32.mxu1 %vm3210_vm0, %v3211_v1 }
 0x4c9   :  { %3015 = vmatprep.subr.bf16.mxu1 %v3209_v0 }
 0x4ca   :  { %3166 = vtanh.f32 %v1248_v4 }
 0x4cc   :  { %3017 = vmatpush3.bf16.msra.mxu1 %v3404_v42 }
 0x4cd   :  { %3018 = vmatprep.subr.bf16.mxu1 %v3209_v0 }
 0x4d0   :  { %3020 = vmatpush3.bf16.msra.mxu1 %v3417_v46 }
 0x4d1   :  { %3021 = vmatprep.subr.bf16.mxu1 %v3209_v0 }
 0x4d4   :  { %v3167_v6 = vpop.eup %3166  ;;  %3023 = vmatpush3.bf16.msra.mxu1 %v3423_v48 }
 0x4d5   :  { %3036 = vmatprep.subr.bf16.mxu1 %v3209_v0 }
 0x4d7   :  { %2648 = vmatmul.mubr.msk.f32.vlgmr.msra.gmra.mrb[14].mxu1 %vm224_vm2, %v3167_v6 }
 0x4d8   :  { %3038 = vmatpush3.bf16.msra.mxu1 %v3296_v9  ;;  %2685 = vmatprep.mubr.msk.f32.mxu1 %vm3210_vm0, %v3211_v1 }
 0x4d9   :  { %3039 = vmatprep.subr.bf16.mxu1 %v3209_v0 }
 0x4dc   :  { %3041 = vmatpush3.bf16.msra.mxu1 %v3316_v17 }
 0x4dd   :  { %3042 = vmatprep.subr.bf16.mxu1 %v3209_v0 }
 0x4e0   :  { %3044 = vmatpush3.bf16.msra.mxu1 %v3336_v22 }
 0x4e1   :  { %3045 = vmatprep.subr.bf16.mxu1 %v3209_v0 }
 0x4e4   :  { %3047 = vmatpush3.bf16.msra.mxu1 %v3354_v27 }
 0x4e5   :  { %3060 = vmatprep.subr.bf16.mxu1 %v3209_v0 }
 0x4e7   :  { %2686 = vmatmul.mubr.msk.f32.vlgmr.msra.gmra.mrb[16].mxu1 %vm224_vm2, %v3167_v6 }
 0x4e8   :  { %3062 = vmatpush3.bf16.msra.mxu1 %v3309_v15  ;;  %2723 = vmatprep.mubr.msk.f32.mxu1 %vm3210_vm0, %v3211_v1 }
 0x4e9   :  { %3063 = vmatprep.subr.bf16.mxu1 %v3209_v0 }
 0x4ec   :  { %3065 = vmatpush3.bf16.msra.mxu1 %v3367_v30 }
 0x4ed   :  { %3066 = vmatprep.subr.bf16.mxu1 %v3209_v0 }
 0x4f0   :  { %3068 = vmatpush3.bf16.msra.mxu1 %v3373_v33 }
 0x4f1   :  { %3069 = vmatprep.subr.bf16.mxu1 %v3209_v0 }
 0x4f4   :  { %3071 = vmatpush3.bf16.msra.mxu1 %v3379_v36 }
 0x4f5   :  { %3084 = vmatprep.subr.bf16.mxu1 %v3209_v0 }
 0x59a   :  { %v1174_v60 = vpop.f32.mrb[12].mxu1 }
 0x59b   :  { %v2611_v7 = vpop.f32.mrb[13].mxu1 }
 0x5aa   :  { %v1319_v8 = vpop.f32.mrb[14].mxu1 }
 0x5ab   :  { %v1320_v10 = vadd.f32 %v1319_v8, %v1174_v60  ;;  %v2649_v12 = vpop.f32.mrb[15].mxu1 }
 0x5ad   :  { %v1323_v13 = vadd.f32 %v3468_v11, %v1320_v10 }
 0x5af   :  { %3168 = vtanh.f32 %v1323_v13 }
 0x5b9   :  { %v3169_v14 = vpop.eup %3168 }
 0x5ba   :  { %2667 = vmatmul.mubr.msk.f32.vlgmr.msra.gmra.mrb[22].mxu0 %vm224_vm2, %v3169_v14  ;;  %v1464_v16 = vpop.f32.mrb[16].mxu1 }
 0x5bb   :  { %v1468_v18 = vadd.f32 %v1464_v16, %v3435_v58  ;;  %3050 = vmatpush3.bf16.msra.mxu0 %v3391_v39  ;;  %v2687_v19 = vpop.f32.mrb[17].mxu1  ;;  %2704 = vmatprep.mubr.msk.f32.mxu0 %vm3210_vm0, %v3211_v1 }
 0x5bc   :  { %3051 = vmatprep.subr.bf16.mxu0 %v3209_v0 }
 0x5bd   :  { %3170 = vtanh.f32 %v1468_v18 }
 0x5bf   :  { %3053 = vmatpush3.bf16.msra.mxu0 %v3404_v42 }
 0x5c0   :  { %3054 = vmatprep.subr.bf16.mxu0 %v3209_v0 }
 0x5c3   :  { %3056 = vmatpush3.bf16.msra.mxu0 %v3417_v46 }
 0x5c4   :  { %3057 = vmatprep.subr.bf16.mxu0 %v3209_v0 }
 0x5c7   :  { %v3171_v20 = vpop.eup %3170  ;;  %3059 = vmatpush3.bf16.msra.mxu0 %v3423_v48 }
 0x5c8   :  { %3072 = vmatprep.subr.bf16.mxu0 %v3209_v0 }
 0x5ca   :  { %2705 = vmatmul.mubr.msk.f32.vlgmr.msra.gmra.mrb[24].mxu0 %vm224_vm2, %v3171_v20 }
 0x5cb   :  { %3074 = vmatpush3.bf16.msra.mxu0 %v3296_v9  ;;  %2742 = vmatprep.mubr.msk.f32.mxu0 %vm3210_vm0, %v3211_v1 }
 0x5cc   :  { %3075 = vmatprep.subr.bf16.mxu0 %v3209_v0 }
 0x5cf   :  { %3077 = vmatpush3.bf16.msra.mxu0 %v3316_v17 }
 0x5d0   :  { %3078 = vmatprep.subr.bf16.mxu0 %v3209_v0 }
 0x5d3   :  { %3080 = vmatpush3.bf16.msra.mxu0 %v3336_v22 }
 0x5d4   :  { %3081 = vmatprep.subr.bf16.mxu0 %v3209_v0 }
 0x5d7   :  { %3083 = vmatpush3.bf16.msra.mxu0 %v3354_v27 }
 0x5d8   :  { %3096 = vmatprep.subr.bf16.mxu0 %v3209_v0 }
 0x5da   :  { %2743 = vmatmul.mubr.msk.f32.vlgmr.msra.gmra.mrb[26].mxu0 %vm224_vm2, %v3171_v20 }
 0x5db   :  { %3098 = vmatpush3.bf16.msra.mxu0 %v3309_v15  ;;  %2780 = vmatprep.mubr.msk.f32.mxu0 %vm3210_vm0, %v3211_v1 }
 0x5dc   :  { %3099 = vmatprep.subr.bf16.mxu0 %v3209_v0 }
 0x5df   :  { %3101 = vmatpush3.bf16.msra.mxu0 %v3367_v30 }
 0x5e0   :  { %3102 = vmatprep.subr.bf16.mxu0 %v3209_v0 }
 0x5e3   :  { %3104 = vmatpush3.bf16.msra.mxu0 %v3373_v33 }
 0x5e4   :  { %3105 = vmatprep.subr.bf16.mxu0 %v3209_v0 }
 0x5e7   :  { %3107 = vmatpush3.bf16.msra.mxu0 %v3379_v36 }
 0x5e8   :  { %3120 = vmatprep.subr.bf16.mxu0 %v3209_v0 }
 0x68d   :  { %v1394_v58 = vpop.f32.mrb[22].mxu0 }
 0x68e   :  { %v2668_v21 = vpop.f32.mrb[23].mxu0 }
 0x69d   :  { %v1539_v15 = vpop.f32.mrb[24].mxu0 }
 0x69e   :  { %v1540_v23 = vadd.f32 %v1539_v15, %v1394_v58  ;;  %v2706_v24 = vpop.f32.mrb[25].mxu0 }
 0x6a0   :  { %v1543_v25 = vadd.f32 %v3468_v11, %v1540_v23 }
 0x6a2   :  { %3172 = vtanh.f32 %v1543_v25 }
 0x6ac   :  { %v3173_v26 = vpop.eup %3172 }
 0x6ad   :  { %2724 = vmatmul.mubr.msk.f32.vlgmr.msra.gmra.mrb[18].mxu1 %vm224_vm2, %v3173_v26  ;;  %v1684_v30 = vpop.f32.mrb[26].mxu0 }
 0x6ae   :  { %v1688_v33 = vadd.f32 %v1684_v30, %v3441_v2  ;;  %3086 = vmatpush3.bf16.msra.mxu1 %v3391_v39  ;;  %v2744_v28 = vpop.f32.mrb[27].mxu0  ;;  %2761 = vmatprep.mubr.msk.f32.mxu1 %vm3210_vm0, %v3211_v1 }
 0x6af   :  { %3087 = vmatprep.subr.bf16.mxu1 %v3209_v0 }
 0x6b0   :  { %3174 = vtanh.f32 %v1688_v33 }
 0x6b2   :  { %3089 = vmatpush3.bf16.msra.mxu1 %v3404_v42 }
 0x6b3   :  { %3090 = vmatprep.subr.bf16.mxu1 %v3209_v0 }
 0x6b6   :  { %3092 = vmatpush3.bf16.msra.mxu1 %v3417_v46 }
 0x6b7   :  { %3093 = vmatprep.subr.bf16.mxu1 %v3209_v0 }
 0x6ba   :  { %v3175_v36 = vpop.eup %3174  ;;  %3095 = vmatpush3.bf16.msra.mxu1 %v3423_v48 }
 0x6bb   :  { %3108 = vmatprep.subr.bf16.mxu1 %v3209_v0 }
 0x6bd   :  { %2762 = vmatmul.mubr.msk.f32.vlgmr.msra.gmra.mrb[20].mxu1 %vm224_vm2, %v3175_v36 }
 0x6be   :  { %3110 = vmatpush3.bf16.msra.mxu1 %v3296_v9  ;;  %2799 = vmatprep.mubr.msk.f32.mxu1 %vm3210_vm0, %v3211_v1 }
 0x6bf   :  { %3111 = vmatprep.subr.bf16.mxu1 %v3209_v0 }
 0x6c2   :  { %3113 = vmatpush3.bf16.msra.mxu1 %v3316_v17 }
 0x6c3   :  { %3114 = vmatprep.subr.bf16.mxu1 %v3209_v0 }
 0x6c6   :  { %3116 = vmatpush3.bf16.msra.mxu1 %v3336_v22 }
 0x6c7   :  { %3117 = vmatprep.subr.bf16.mxu1 %v3209_v0 }
 0x6ca   :  { %3119 = vmatpush3.bf16.msra.mxu1 %v3354_v27 }
 0x6cb   :  { %3132 = vmatprep.subr.bf16.mxu1 %v3209_v0 }
 0x6cd   :  { %2800 = vmatmul.mubr.msk.f32.vlgmr.msra.gmra.mrb[22].mxu1 %vm224_vm2, %v3175_v36 }
 0x6ce   :  { %2837 = vmatprep.mubr.msk.f32.mxu1 %vm3210_vm0, %v3211_v1 }
 0x780   :  { %v1614_v9 = vpop.f32.mrb[18].mxu1 }
 0x781   :  { %v2725_v2 = vpop.f32.mrb[19].mxu1 }
 0x790   :  { %v1759_v29 = vpop.f32.mrb[20].mxu1 }
 0x791   :  { %v1760_v31 = vadd.f32 %v1759_v29, %v1614_v9  ;;  %v2763_v17 = vpop.f32.mrb[21].mxu1 }
 0x793   :  { %v1763_v32 = vadd.f32 %v3468_v11, %v1760_v31 }
 0x795   :  { %3176 = vtanh.f32 %v1763_v32 }
 0x79f   :  { %v3177_v22 = vpop.eup %3176 }
 0x7a0   :  { %2781 = vmatmul.mubr.msk.f32.vlgmr.msra.gmra.mrb[28].mxu0 %vm224_vm2, %v3177_v22  ;;  %v1904_v34 = vpop.f32.mrb[22].mxu1 }
 0x7a1   :  { %v1908_v27 = vadd.f32 %v1904_v34, %v3439_v62  ;;  %3122 = vmatpush3.bf16.msra.mxu0 %v3391_v39  ;;  %v2801_v35 = vpop.f32.mrb[23].mxu1  ;;  %2818 = vmatprep.mubr.msk.f32.mxu0 %vm3210_vm0, %v3211_v1  ;;  %v1985_v1 = vld [vmem:[%s3726_s7] sm:$0xff]  ;;  %v1986_v39 = vld [vmem:[%s3726_s7 + $0x8] sm:$0xff] }
 0x7a2   :  { %3123 = vmatprep.subr.bf16.mxu0 %v3209_v0 }
 0x7a3   :  { %3178 = vtanh.f32 %v1908_v27 }
 0x7a5   :  { %3125 = vmatpush3.bf16.msra.mxu0 %v3404_v42  ;;  %v3133_v42 = vpack.c.bf16 %v1986_v39, %v1985_v1 }
 0x7a6   :  { %3126 = vmatprep.subr.bf16.mxu0 %v3209_v0 }
 0x7a7   :  { %3134 = vmatpush3.bf16.msra.mxu1 %v3133_v42 }
 0x7a8   :  { %3135 = vmatprep.subr.bf16.mxu1 %v3209_v0 }
 0x7a9   :  { %3128 = vmatpush3.bf16.msra.mxu0 %v3417_v46  ;;  %v1987_v46 = vld [vmem:[%s3726_s7 + $0x10] sm:$0xff] }
 0x7aa   :  { %3129 = vmatprep.subr.bf16.mxu0 %v3209_v0 }
 0x7ad   :  { %v3179_v37 = vpop.eup %3178  ;;  %3131 = vmatpush3.bf16.msra.mxu0 %v3423_v48  ;;  %v1988_v48 = vld [vmem:[%s3726_s7 + $0x18] sm:$0xff] }
 0x7ae   :  { %v3136_v62 = vpack.c.bf16 %v1988_v48, %v1987_v46 }
 0x7b0   :  { %2819 = vmatmul.mubr.msk.f32.vlgmr.msra.gmra.mrb[30].mxu0 %vm224_vm2, %v3179_v37  ;;  %3137 = vmatpush3.bf16.msra.mxu1 %v3136_v62 }
 0x7b1   :  { %3138 = vmatprep.subr.bf16.mxu1 %v3209_v0 }
 0x7b4   :  { %3140 = vmatpush3.bf16.msra.mxu1 %v3139_v41 }
 0x7b5   :  { %3141 = vmatprep.subr.bf16.mxu1 %v3209_v0 }
 0x7b8   :  { %3143 = vmatpush3.bf16.msra.mxu1 %v3142_v45 }
 0x873   :  { %v1834_v47 = vpop.f32.mrb[28].mxu0 }
 0x874   :  { %v2782_v49 = vpop.f32.mrb[29].mxu0 }
 0x883   :  { %v1979_v50 = vpop.f32.mrb[30].mxu0 }
 0x884   :  { %v1980_v51 = vadd.f32 %v1979_v50, %v1834_v47  ;;  %v2820_v52 = vpop.f32.mrb[31].mxu0 }
 0x886   :  { %v1983_v53 = vadd.f32 %v3468_v11, %v1980_v51 }
 0x888   :  { %3180 = vtanh.f32 %v1983_v53 }
 0x892   :  { %v3181_v54 = vpop.eup %3180 }
 0x893   :  { %2838 = vmatmul.mubr.msk.f32.vlgmr.msra.gmra.mrb[24].mxu1 %vm224_vm2, %v3181_v54 }
 0x966   :  { %v2069_v56 = vpop.f32.mrb[24].mxu1 }
 0x967   :  { %v2070_v57 = vadd.f32 %v2112_v55, %v2069_v56  ;;  %v2839_v0 = vpop.f32.mrb[25].mxu1 }
 0x969   :  { %2074 = vst.msk [vmem:[%s3728_s9] sm:$0xff] %vm2073_vm3, %v2070_v57 }
 0x96a   :  { %2079 = vsyncpa [#allocation3], 1 }

</bundles_post_ra>
